<compile_context>
chip_gen: v7x
topology: tpu7x:2x2x1
jax: 0.10.0
libtpu: 0.0.40
codegen_flags: <defaults>
</compile_context>

<pallas_src>
import jax
import jax.numpy as jnp
from jax import lax
from jax.experimental import pallas as pl
from jax.experimental.pallas import tpu as pltpu


def _gpe_kernel(x_ref, w_ref, b_ref, o_ref):
    """Fused 3x3 conv + folded-BN bias + ReLU for one (batch, row-tile) grid cell.

    x_ref : (TH+2, W, 3*Cin)  kw-merged input tile with a 1-row halo on each side
    w_ref : (3, 3*Cin, Cout)  BN-scale-folded weights, one K=3*Cin slab per kh tap
    b_ref : (1, Cout)         folded conv-bias + BN shift (f32)
    o_ref : (TH*W, Cout)      one row tile of the (B, H*W, C) token output
    """
    th = x_ref.shape[0] - 2
    wdim = x_ref.shape[1]
    kdim = x_ref.shape[2]
    thw = th * wdim

    slab = x_ref[...]                                   # (TH+2, W, 3*Cin)

    # One MXU matmul per kernel row (kh tap), f32 accumulation in vector registers:
    # no VMEM accumulator scratch, no per-tap read-modify-write.
    acc = jnp.dot(slab[0:th].reshape(thw, kdim), w_ref[0],
                  preferred_element_type=jnp.float32)
    acc = acc + jnp.dot(slab[1:th + 1].reshape(thw, kdim), w_ref[1],
                        preferred_element_type=jnp.float32)
    acc = acc + jnp.dot(slab[2:th + 2].reshape(thw, kdim), w_ref[2],
                        preferred_element_type=jnp.float32)

    # Epilogue: bias (conv bias + BN shift) + ReLU fused into the single store.
    o_ref[...] = jnp.maximum(acc + b_ref[...], 0.0).astype(o_ref.dtype)


def _fold_params(conv_w, conv_b, bn_gamma, bn_beta, bn_mean, bn_var, eps,
                 n_groups, in_chans, matmul_dtype):
    """Fold conv bias + inference BatchNorm into the conv weights and a shift row.

    Returns (w_taps, shift): w_taps is (3, 3*Cin, Cout) with the grouped structure
    laid out block-diagonally along the dense Cin axis (one dense matmul implements
    the grouped conv) and the three kw taps of each kernel row stacked along K.
    shift is (1, Cout) float32.

    NOTE: the block-diagonal densification makes K = in_chans (not in_chans/n_groups).
    That is free while in_chans <= 128 (zero K rows ride along in the same MXU pass);
    for larger grouped configs split groups onto a grid axis instead.
    """
    cout, cin_g, kh_, kw_ = conv_w.shape
    assert (kh_, kw_) == (3, 3)
    assert cin_g * n_groups == in_chans and cout % n_groups == 0
    scale = bn_gamma / jnp.sqrt(bn_var + eps)            # (Cout,)
    shift = (conv_b - bn_mean) * scale + bn_beta         # (Cout,)
    w_hwio = jnp.transpose(conv_w, (2, 3, 1, 0))         # (3, 3, Cin_g, Cout)
    cout_g = cout // n_groups
    w_full = jnp.zeros((3, 3, in_chans, cout), conv_w.dtype)
    for g in range(n_groups):
        w_full = w_full.at[:, :, g * cin_g:(g + 1) * cin_g,
                           g * cout_g:(g + 1) * cout_g].set(
            w_hwio[:, :, :, g * cout_g:(g + 1) * cout_g])
    w_full = w_full * scale[None, None, None, :]          # fold BN scale (f32)
    w_taps = w_full.reshape(3, 3 * in_chans, cout)        # row index = kw*Cin + c
    return w_taps.astype(matmul_dtype), shift.reshape(1, cout).astype(jnp.float32)


def _pick_row_tile(h, w, max_rows, min_tiles=1):
    """Largest divisor TH of H with TH*W <= max_rows, TH*W % 8 == 0 (or TH == H),
    and at least `min_tiles` row tiles.  Falls back to a single full-height tile
    (always layout-legal) if no divisor satisfies the constraints."""
    candidates = [th for th in range(h, 0, -1)
                  if h % th == 0
                  and h // th >= min_tiles
                  and th * w <= max_rows
                  and ((th * w) % 8 == 0 or th == h)]
    if candidates:
        return candidates[0]
    # Explicit guard (review note): nothing qualifies -> one full-height tile, which
    # may exceed max_rows but is always a legal block (full-extent row dim).
    return h


def _padded_vmem_bytes(shape, itemsize):
    """Crude VMEM footprint estimate: pad 2nd-minor dim to 8, minor dim to 128."""
    lead = 1
    for d in shape[:-2]:
        lead *= d
    sub = -(-shape[-2] // 8) * 8
    lane = -(-shape[-1] // 128) * 128
    return lead * sub * lane * itemsize


def grouped_pixel_embedding_forward(
        x, conv_w, conv_b, bn_gamma, bn_beta, bn_mean, bn_var, *,
        n_groups=1, eps=1e-5, max_rows_per_tile=256, matmul_dtype=jnp.float32):
    """GroupedPixelEmbedding.forward.

    x: (B, in_chans, H, W) NCHW like the PyTorch module.
    Returns (tokens, after_feature_map_size), tokens of shape (B, H*W, embed_dim).
    BatchNorm is applied in inference mode (running stats folded into the conv).
    On v6e/v7x set matmul_dtype=jnp.bfloat16 for MXU rate and halved input/weight
    DMA (expect ~1e-2 tolerances versus an f32 reference).
    """
    n, cin, hdim, wdim = x.shape
    cout = conv_w.shape[0]
    out_dtype = x.dtype

    w_taps, bias = _fold_params(conv_w, conv_b, bn_gamma, bn_beta, bn_mean,
                                bn_var, eps, n_groups, cin, matmul_dtype)

    # NCHW -> NHWC, 1-pixel zero halo, then merge the three kw taps along the channel
    # axis (K = 3*Cin) so the kernel never does unaligned kw sublane slices.  These
    # wrapper passes only touch the tiny Cin-wide input (cheap next to the
    # embed_dim-wide output write).
    xh = jnp.transpose(x, (0, 2, 3, 1)).astype(matmul_dtype)        # (B, H, W, Cin)
    xp = jnp.pad(xh, ((0, 0), (1, 1), (1, 1), (0, 0)))              # (B, H+2, W+2, Cin)
    xk = jnp.concatenate(
        [xp[:, :, 0:wdim], xp[:, :, 1:wdim + 1], xp[:, :, 2:wdim + 2]],
        axis=-1)                                                     # (B, H+2, W, 3*Cin)

    # Row tiling: prefer >=2 row tiles when B == 1 so both TensorCores (v7x megacore)
    # get parallel work; otherwise the largest tile under max_rows_per_tile.
    min_tiles = 2 if (n == 1 and hdim >= 2) else 1
    th = _pick_row_tile(hdim, wdim, max_rows_per_tile, min_tiles)
    n_tiles = hdim // th

    # Per-row-tile halo blocks: resident VMEM is bounded by the tile (not H*W), which
    # keeps the lane-padded Cin-minor input within v7x's 64 MiB / scoped defaults.
    x_tiles = jnp.stack([xk[:, t * th:t * th + th + 2] for t in range(n_tiles)],
                        axis=1)                            # (B, nT, TH+2, W, 3*Cin)

    kdim = 3 * cin
    item_in = jnp.dtype(matmul_dtype).itemsize
    item_out = jnp.dtype(out_dtype).itemsize

    est = (2 * _padded_vmem_bytes((th + 2, wdim, kdim), item_in)
           + 2 * _padded_vmem_bytes((th * wdim, cout), item_out)
           + 2 * _padded_vmem_bytes((3, kdim, cout), item_in)
           + 2 * _padded_vmem_bytes((1, cout), 4))
    vmem_limit = int(min(48 * 2 ** 20, max(32 * 2 ** 20, 2 * est + 4 * 2 ** 20)))

    cost = pl.CostEstimate(
        flops=2 * n * hdim * wdim * 9 * cin * cout,
        transcendentals=0,
        bytes_accessed=int(x_tiles.size * item_in + w_taps.size * item_in
                           + bias.size * 4 + n * hdim * wdim * cout * item_out))

    tokens = pl.pallas_call(
        _gpe_kernel,
        out_shape=jax.ShapeDtypeStruct((n, hdim * wdim, cout), out_dtype),
        grid_spec=pltpu.PrefetchScalarGridSpec(
            num_scalar_prefetch=0,
            grid=(n, n_tiles),
            in_specs=[
                # One halo'ed row tile per grid step (leading batch/tile dims squeezed).
                pl.BlockSpec((None, None, th + 2, wdim, kdim),
                             lambda b, t: (b, t, 0, 0, 0)),
                # BN-folded weights and bias: constant index_map -> resident.
                pl.BlockSpec((3, kdim, cout), lambda b, t: (0, 0, 0)),
                pl.BlockSpec((1, cout), lambda b, t: (0, 0)),
            ],
            out_specs=pl.BlockSpec((None, th * wdim, cout),
                                   lambda b, t: (b, t, 0)),
        ),
        compiler_params=pltpu.CompilerParams(
            dimension_semantics=("parallel", "parallel"),
            vmem_limit_bytes=vmem_limit),
        cost_estimate=cost,
    )(x_tiles, w_taps, bias)

    return tokens, hdim


if __name__ == "__main__":
    key = jax.random.PRNGKey(0)

    def make_params(k, in_chans, embed_dim, n_groups):
        ks = jax.random.split(k, 6)
        cin_g = in_chans // n_groups
        fan_in = cin_g * 9
        conv_w = jax.random.normal(ks[0], (embed_dim, cin_g, 3, 3),
                                   jnp.float32) * (1.0 / fan_in) ** 0.5
        conv_b = 0.05 * jax.random.normal(ks[1], (embed_dim,), jnp.float32)
        gamma = 1.0 + 0.1 * jax.random.normal(ks[2], (embed_dim,), jnp.float32)
        beta = 0.1 * jax.random.normal(ks[3], (embed_dim,), jnp.float32)
        mean = 0.1 * jax.random.normal(ks[4], (embed_dim,), jnp.float32)
        var = 1.0 + 0.5 * jax.random.uniform(ks[5], (embed_dim,), jnp.float32)
        return conv_w, conv_b, gamma, beta, mean, var

    def reference(x, conv_w, conv_b, gamma, beta, mean, var, eps, n_groups):
        y = lax.conv_general_dilated(
            x, conv_w, window_strides=(1, 1), padding="SAME",
            dimension_numbers=("NCHW", "OIHW", "NCHW"),
            feature_group_count=n_groups)
        y = y + conv_b[None, :, None, None]
        scale = gamma / jnp.sqrt(var + eps)
        y = (y - mean[None, :, None, None]) * scale[None, :, None, None] \
            + beta[None, :, None, None]
        y = jnp.maximum(y, 0.0)
        b, c, h, w = y.shape
        return jnp.transpose(y.reshape(b, c, h * w), (0, 2, 1))

    # Case 1: module defaults (in_chans=3, embed_dim=128, n_groups=1), ifm=16.
    # Small row tiles so the spatial pipeline axis is exercised (grid = (2, 4)).
    kx, kp, key = jax.random.split(key, 3)
    x = jax.random.normal(kx, (2, 3, 16, 16), jnp.float32)
    p = make_params(kp, 3, 128, 1)
    out, fm = grouped_pixel_embedding_forward(x, *p, n_groups=1,
                                              max_rows_per_tile=64)
    out = jax.block_until_ready(out)
    ref = reference(x, *p, 1e-5, 1)
    assert out.shape == (2, 16 * 16, 128) and fm == 16, out.shape
    assert jnp.allclose(out, ref, atol=1e-3, rtol=1e-3), "case 1 mismatch"

    # Case 2: grouped-conv path (in_chans=8, embed_dim=64, n_groups=4), ifm=8.
    kx, kp, key = jax.random.split(key, 3)
    x2 = jax.random.normal(kx, (2, 8, 8, 8), jnp.float32)
    p2 = make_params(kp, 8, 64, 4)
    out2, fm2 = grouped_pixel_embedding_forward(x2, *p2, n_groups=4)
    out2 = jax.block_until_ready(out2)
    ref2 = reference(x2, *p2, 1e-5, 4)
    assert out2.shape == (2, 64, 64) and fm2 == 8, out2.shape
    assert jnp.allclose(out2, ref2, atol=1e-3, rtol=1e-3), "case 2 mismatch"

    print("KERNEL_OK")
</pallas_src>

<mosaic_0001>
module attributes {stable_mosaic.version = 11 : i64} {
  func.func @_gpe_kernel(%arg0: i32, %arg1: i32, %arg2: memref<1x1x6x16x9xf32, #tpu.memory_space<vmem>>, %arg3: memref<3x9x128xf32, #tpu.memory_space<vmem>>, %arg4: memref<1x128xf32, #tpu.memory_space<vmem>>, %arg5: memref<1x64x128xf32, #tpu.memory_space<vmem>>) attributes {dimension_semantics = [#tpu.dimension_semantics<parallel>, #tpu.dimension_semantics<parallel>], iteration_bounds = array<i64: 2, 4>, scalar_prefetch = 0 : i64, scratch_operands = 0 : i64, tpu.core_type = #tpu.core_type<tc>, window_params = [{transform_indices = @transform_0, window_bounds = array<i64: 1, 1, 6, 16, 9>}, {pipeline_mode = #tpu.pipeline_mode<synchronous>, transform_indices = @transform_1, window_bounds = array<i64: 3, 9, 128>}, {pipeline_mode = #tpu.pipeline_mode<synchronous>, transform_indices = @transform_2, window_bounds = array<i64: 1, 128>}, {transform_indices = @transform_3, window_bounds = array<i64: 1, 64, 128>}]} {
    %c0 = arith.constant 0 : index
    %c0_0 = arith.constant 0 : index
    %c0_1 = arith.constant 0 : index
    %c0_2 = arith.constant 0 : index
    %c0_3 = arith.constant 0 : index
    %0 = vector.load %arg2[%c0, %c0_0, %c0_1, %c0_2, %c0_3] : memref<1x1x6x16x9xf32, #tpu.memory_space<vmem>>, vector<1x1x6x16x9xf32>
    %1 = vector.shape_cast %0 : vector<1x1x6x16x9xf32> to vector<6x16x9xf32>
    %2 = vector.extract_strided_slice %1 {offsets = [0, 0, 0], sizes = [4, 16, 9], strides = [1, 1, 1]} : vector<6x16x9xf32> to vector<4x16x9xf32>
    %3 = vector.shape_cast %2 : vector<4x16x9xf32> to vector<64x9xf32>
    %c0_4 = arith.constant 0 : index
    %c0_5 = arith.constant 0 : index
    %c0_6 = arith.constant 0 : index
    %4 = vector.load %arg3[%c0_4, %c0_5, %c0_6] : memref<3x9x128xf32, #tpu.memory_space<vmem>>, vector<1x9x128xf32>
    %5 = vector.shape_cast %4 : vector<1x9x128xf32> to vector<9x128xf32>
    %cst = arith.constant dense<0.000000e+00> : vector<64x128xf32>
    %6 = tpu.matmul %3, %5, %cst {dimension_numbers = #tpu.dot_dimension_numbers<[1], [0], [0], [1], [0, 0, 1, 1], [], []>} : vector<64x9xf32>, vector<9x128xf32>, vector<64x128xf32> -> vector<64x128xf32>
    %7 = vector.extract_strided_slice %1 {offsets = [1, 0, 0], sizes = [4, 16, 9], strides = [1, 1, 1]} : vector<6x16x9xf32> to vector<4x16x9xf32>
    %8 = vector.shape_cast %7 : vector<4x16x9xf32> to vector<64x9xf32>
    %c1 = arith.constant 1 : index
    %c0_7 = arith.constant 0 : index
    %c0_8 = arith.constant 0 : index
    %9 = vector.load %arg3[%c1, %c0_7, %c0_8] : memref<3x9x128xf32, #tpu.memory_space<vmem>>, vector<1x9x128xf32>
    %10 = vector.shape_cast %9 : vector<1x9x128xf32> to vector<9x128xf32>
    %cst_9 = arith.constant dense<0.000000e+00> : vector<64x128xf32>
    %11 = tpu.matmul %8, %10, %cst_9 {dimension_numbers = #tpu.dot_dimension_numbers<[1], [0], [0], [1], [0, 0, 1, 1], [], []>} : vector<64x9xf32>, vector<9x128xf32>, vector<64x128xf32> -> vector<64x128xf32>
    %12 = arith.addf %6, %11 : vector<64x128xf32>
    %13 = vector.extract_strided_slice %1 {offsets = [2, 0, 0], sizes = [4, 16, 9], strides = [1, 1, 1]} : vector<6x16x9xf32> to vector<4x16x9xf32>
    %14 = vector.shape_cast %13 : vector<4x16x9xf32> to vector<64x9xf32>
    %c2 = arith.constant 2 : index
    %c0_10 = arith.constant 0 : index
    %c0_11 = arith.constant 0 : index
    %15 = vector.load %arg3[%c2, %c0_10, %c0_11] : memref<3x9x128xf32, #tpu.memory_space<vmem>>, vector<1x9x128xf32>
    %16 = vector.shape_cast %15 : vector<1x9x128xf32> to vector<9x128xf32>
    %cst_12 = arith.constant dense<0.000000e+00> : vector<64x128xf32>
    %17 = tpu.matmul %14, %16, %cst_12 {dimension_numbers = #tpu.dot_dimension_numbers<[1], [0], [0], [1], [0, 0, 1, 1], [], []>} : vector<64x9xf32>, vector<9x128xf32>, vector<64x128xf32> -> vector<64x128xf32>
    %18 = arith.addf %12, %17 : vector<64x128xf32>
    %c0_13 = arith.constant 0 : index
    %c0_14 = arith.constant 0 : index
    %19 = vector.load %arg4[%c0_13, %c0_14] : memref<1x128xf32, #tpu.memory_space<vmem>>, vector<1x128xf32>
    %20 = vector.broadcast %19 : vector<1x128xf32> to vector<64x128xf32>
    %21 = arith.addf %18, %20 : vector<64x128xf32>
    %cst_15 = arith.constant 0.000000e+00 : f32
    %22 = vector.broadcast %cst_15 : f32 to vector<64x128xf32>
    %23 = arith.maximumf %21, %22 : vector<64x128xf32>
    %c0_16 = arith.constant 0 : index
    %c0_17 = arith.constant 0 : index
    %c0_18 = arith.constant 0 : index
    %24 = vector.load %arg5[%c0_16, %c0_17, %c0_18] : memref<1x64x128xf32, #tpu.memory_space<vmem>>, vector<1x64x128xf32>
    %25 = vector.shape_cast %24 : vector<1x64x128xf32> to vector<64x128xf32>
    %26 = vector.shape_cast %23 : vector<64x128xf32> to vector<1x64x128xf32>
    tpu.vector_store %arg5[%c0_16, %c0_17, %c0_18], %26 {strides = array<i32>} : memref<1x64x128xf32, #tpu.memory_space<vmem>>, vector<1x64x128xf32>,
    return
  }
  func.func @transform_0(%arg0: i32, %arg1: i32) -> (i32, i32, i32, i32, i32) {
    %c0_i32 = arith.constant 0 : i32
    %c0_i32_0 = arith.constant 0 : i32
    %c0_i32_1 = arith.constant 0 : i32
    %c0_i32_2 = arith.constant 0 : i32
    return %arg0, %arg1, %c0_i32, %c0_i32_0, %c0_i32_1 : i32, i32, i32, i32, i32
  }
  func.func @transform_1(%arg0: i32, %arg1: i32) -> (i32, i32, i32) {
    %c0_i32 = arith.constant 0 : i32
    %c0_i32_0 = arith.constant 0 : i32
    %c0_i32_1 = arith.constant 0 : i32
    %c0_i32_2 = arith.constant 0 : i32
    return %c0_i32, %c0_i32_0, %c0_i32_1 : i32, i32, i32
  }
  func.func @transform_2(%arg0: i32, %arg1: i32) -> (i32, i32) {
    %c0_i32 = arith.constant 0 : i32
    %c0_i32_0 = arith.constant 0 : i32
    %c0_i32_1 = arith.constant 0 : i32
    return %c0_i32, %c0_i32_0 : i32, i32
  }
  func.func @transform_3(%arg0: i32, %arg1: i32) -> (i32, i32, i32) {
    %c0_i32 = arith.constant 0 : i32
    %c0_i32_0 = arith.constant 0 : i32
    return %arg0, %arg1, %c0_i32 : i32, i32, i32
  }
}

</mosaic_0001>

<bundles_post_ra>
// kernel: tpu_custom_call.1
= control target key start
LH: loop header
LB: loop body
LE: loop exit
PB: predicated region body
PF: predicated region fallthrough
CT: control target
= control target key end

     0   :  { %8 = vsyncpa [#allocation3], 0  ;;  %s1309_s0 = inlined_call_operand.vmem [shape: f32[2,4,6,16,9], index: 0, kind: input, shape index: {}]   ;;  %s1310_s1 = inlined_call_operand.vmem [shape: f32[3,9,128], index: 1, kind: input, shape index: {}]   ;;  %s1311_s2 = inlined_call_operand.vmem [shape: f32[1,128], index: 2, kind: input, shape index: {}]   ;;  %s1312_s3 = inlined_call_operand.hbm [shape: f32[2,256,128], index: 3, kind: output, shape index: {}]  }
   0x1   :  { %10 = vsyncpa [#allocation3 + $0x1], 0  ;;  %s1075_s12 = smov 0   ;;  %s1077_s13 = smov 0  }
   0x2   :  { %s1079_s14 = smov 0   ;;  %s1081_s15 = smov 0  }
   0x3   :  { %s1083_s16 = smov 0   ;;  %s1085_s17 = smov 0  }
   0x4   :  { %s1087_s18 = smov 0   ;;  %s1089_s19 = smov 0  }
   0x5 LB: > { %s720_s20 = sadd.s32 4294967295, %s1049_s19   ;;  %s721_s21 = sadd.s32 4294967294, %s1049_s19   ;;  %s1049_s19 = sphi %s1089_s19, %s16_s19   ;;  %s1045_s18 = sphi %s1087_s18, %s1323_s18   ;;  %s1041_s17 = sphi %s1085_s17, %s1322_s17   ;;  %s1037_s16 = sphi %s1083_s16, %s1321_s16   ;;  %s1033_s15 = sphi %s1081_s15, %s1320_s15   ;;  %s1029_s14 = sphi %s1079_s14, %s1319_s14   ;;  %s1025_s13 = sphi %s1077_s13, %s1318_s13   ;;  %s1021_s12 = sphi %s1075_s12, %s1317_s12  }
   0x6   : > { %s25_s22 = sadd.s32 1, %s1041_s17  ;;  %s28_s23 = sadd.s32 1, %s1045_s18 }
   0x7   : > { %p26_p0 = scmp.ge.s32.totalorder %s25_s22, 4  ;;  %p117_p1 = scmp.ne.s32.totalorder %s1029_s14, %s1025_s13 }
   0x8   : > { %p118_p2 = scmp.eq.s32.totalorder %s720_s20, 7  ;;  %p123_p5 = scmp.ne.s32.totalorder %s1025_s13, %s1021_s12 }
   0x9   : > { %s1325_s22 = smov (%p26_p0, %s25_s22), 0  ;;  %s1327_s23 = smov (!%p26_p0, %s28_s23), %s1045_s18 }
   0xa   : > { %s103_s24 = ssub.s32 %s1041_s17, %s1325_s22  ;;  %p1126_p3 = por %p118_p2, %p117_p1 }
   0xb   : > { %p30_p4 = scmp.ge.s32.totalorder %s1327_s23, 2  ;;  %p124_p6 = scmp.eq.s32.totalorder %s721_s21, 7 }
   0xc   : > { %p724_p7 = scmp.ge.s32.totalorder %s1049_s19, 1  ;;  %p160_p9 = scmp.lt.s32.totalorder %s1049_s19, 9 }
   0xd   : > { %s1329_s23 = smov (%p30_p4, %s1327_s23), 0  ;;  %p1135_p8 = por %p124_p6, %p123_p5 }
   0xe   : > { %s102_s27 = ssub.s32 %s1045_s18, %s1329_s23  ;;  %s107_s28 = sadd.s32 1, %s1029_s14 }
   0xf   : > { %s104_s29 = sor.u32 %s103_s24, %s102_s27  ;;  %p161_p10 = pnand %p724_p7, %p160_p9 }
  0x10   : > { %p105_p11 = scmp.eq.s32.totalorder %s104_s29, 0  ;;  %v727_v0 = vld [vmem:[%s1310_s1 + $0x10] sm:$0xff] (!%p161_p10)  ;;  %v728_v1 = vld [vmem:[%s1310_s1 + $0x18] sm:$0x1] (!%p161_p10)  ;;  %vm240_vm0 = vcmask (!%p161_p10), 1040384   ;;  %v210_v2 = vld [vmem:[%s1310_s1] sm:$0xff] (!%p161_p10) }
  0x11   : > { %164 = sbr.rel (%p161_p10) target bundleno = 288 (0x120), region = 32  ;;  %v843_v3 = vpack.c.bf16 (!%p161_p10), %v728_v1, %v727_v0  ;;  %vm1051_vm1 = vmmov (!%p161_p10), 1   ;;  %v211_v5 = vld [vmem:[%s1310_s1 + $0x8] sm:$0x1] (!%p161_p10)  ;;  %p188_p12 = scmp.lt.s32.totalorder (!%p161_p10), %s1037_s16, 1  ;;  %v747_v6 = vld [vmem:[%s1310_s1 + $0x20] sm:$0xff] (!%p161_p10) }
  0x12   : > { %s1144_s30 = scalar_select %p105_p11, %s1029_s14, %s107_s28  }
  0x13   : > { %vm1155_vm2 = vmpackc.low (!%p161_p10), %vm240_vm0, %vm1051_vm1  ;;  %p190_p13 = scmp.lt.s32.totalorder (!%p161_p10), %s1033_s15, 3  ;;  %v849_v7 = vpack.c.bf16 (!%p161_p10), %v211_v5, %v210_v2  ;;  %v748_v8 = vld [vmem:[%s1310_s1 + $0x28] sm:$0x1] (!%p161_p10)  ;;  %vm215_vm3 = vcmask (!%p161_p10), 72704   ;;  %s185_s11 = sand.u32 (!%p161_p10), 1, %s1025_s13  }
  0x14   : > { %845 = vmatprep.subr.msk.bf16.mxu1 (!%p161_p10), %vm1155_vm2, %v843_v3  ;;  %v855_v9 = vpack.c.bf16 (!%p161_p10), %v748_v8, %v747_v6  ;;  %v758_v27 = vld [vmem:[%s1311_s2] ss:$0 sm:$0xff] (!%p161_p10)  ;;  %s725_s24 = sshll.u32 (!%p161_p10), %s185_s11, 6  ;;  %s1257_s8 = scalar_lea.sflag (!%p161_p10), [#allocation3], %s185_s11 }
  0x15   : > { %851 = vmatprep.subr.msk.bf16.mxu0 (!%p161_p10), %vm1155_vm2, %v849_v7  ;;  %848 = vmatpush3.bf16.msk.msra.mxu1 (!%p161_p10), %vm1155_vm2, %v843_v3  ;;  %s1235_s27 = scalar_lea.vmem (!%p161_p10), [#allocation2], %s725_s24 }
  0x16   : > { %854 = vmatpush3.bf16.msk.msra.mxu0 (!%p161_p10), %vm1155_vm2, %v849_v7  ;;  %861 = vmatprep.subr.msk.bf16.mxu1 (!%p161_p10), %vm1155_vm2, %v849_v7 }
  0x17   : > { %857 = vmatprep.subr.msk.bf16.mxu0 (!%p161_p10), %vm1155_vm2, %v855_v9 }
  0x18   : > { %s189_s28 = scalar_select %p188_p12, %s1037_s16, 1 }
  0x19   : > { %s191_s29 = scalar_select %p190_p13, %s1033_s15, 3 }
  0x1a   : > { %s880_s4 = smul.u32 48, %s189_s28  ;;  %s760_s28 = sshll.u32 %s1033_s15, 3 }
  0x1b   : > { %s879_s5 = smul.u32 12, %s191_s29  ;;  %s761_s29 = sshll.u32 %s1037_s16, 5 }
  0x1c   : > { %s635_s16 = sshll.u32 %s1235_s27, 4  ;;  %s1251_s16 = int_to_ptr.vmem [resolvable:$true] %s635_s16 }
  0x1d   : > { %s194_s6 = sadd.s32 %s880_s4, %s879_s5  ;;  %s632_s4 = sadd.s32 %s761_s29, %s760_s28 }
  0x1e   : > { %s726_s7 = sshll.u32 %s194_s6, 3  ;;  %s762_s15 = sshll.u32 %s632_s4, 7 }
  0x1f   : > { %s1187_s10 = scalar_lea.vmem %s1309_s0, %s726_s7  ;;  %s1249_s7 = scalar_lea.hbm %s1312_s3, %s762_s15 }
  0x20   : > { %v200_v10 = vld [vmem:[%s1187_s10 + $0x10] sm:$0xff]  ;;  %v198_v11 = vld [vmem:[%s1187_s10] sm:$0xff]  ;;  %v201_v12 = vld [vmem:[%s1187_s10 + $0x18] sm:$0xff]  ;;  %s955_s9 = scalar_lea.vmem %s1251_s16, 1024 }
  0x21   : > { %799 = vmatprep.mubr.msk.f32.mxu1 %vm215_vm3, %v200_v10  ;;  %815 = vmatprep.mubr.msk.f32.mxu0 %vm215_vm3, %v198_v11  ;;  %v199_v13 = vld [vmem:[%s1187_s10 + $0x8] sm:$0xff]  ;;  %v202_v14 = vld [vmem:[%s1187_s10 + $0x20] sm:$0xff]  ;;  %v204_v16 = vld [vmem:[%s1187_s10 + $0x30] sm:$0xff]  ;;  %p956_p0 = scmp.ne.s32.totalorder %s1251_s16, %s955_s9 }
  0x22   : > { %800 = vmatmul.mubr.msk.f32.vlgmr.msra.gmra.mrb[0].mxu1 %vm215_vm3, %v201_v12  ;;  %816 = vmatmul.mubr.msk.f32.vlgmr.msra.gmra.mrb[0].mxu0 %vm215_vm3, %v199_v13  ;;  %v203_v15 = vld [vmem:[%s1187_s10 + $0x28] sm:$0xff]  ;;  %v205_v17 = vld [vmem:[%s1187_s10 + $0x38] sm:$0xff]  ;;  %v206_v18 = vld [vmem:[%s1187_s10 + $0x40] sm:$0xff] }
  0x23   : > { %862 = vmatpush3.bf16.msk.msra.mxu1 %vm1155_vm2, %v849_v7  ;;  %860 = vmatpush3.bf16.msk.msra.mxu0 %vm1155_vm2, %v855_v9  ;;  %v207_v19 = vld [vmem:[%s1187_s10 + $0x48] sm:$0xff]  ;;  %v208_v20 = vld [vmem:[%s1187_s10 + $0x50] sm:$0xff]  ;;  %v209_v21 = vld [vmem:[%s1187_s10 + $0x58] sm:$0xff]  ;;  %p957_p1 = pnand %p956_p0, %p1126_p3  ;;  %s1052_s10 = smov [#allocation2]  }
  0x24   : > { %802 = vmatprep.mubr.msk.f32.mxu1 %vm215_vm3, %v202_v14  ;;  %818 = vmatprep.mubr.msk.f32.mxu0 %vm215_vm3, %v200_v10  ;;  %s959_s20 = sshll.u32 %s1052_s10, 4  ;;  %s960_s20 = int_to_ptr.vmem [resolvable:$false] %s959_s20 }
  0x25   : > { %p958_p2 = pneg %p957_p1  ;;  %s961_s21 = scalar_lea.vmem %s960_s20, 2048 }
  0x26   : > { %803 = vmatmul.mubr.msk.f32.gmra.mrb[2].mxu1 %vm215_vm3, %v203_v15  ;;  %819 = vmatmul.mubr.msk.f32.gmra.mrb[2].mxu0 %vm215_vm3, %v201_v12  ;;  %p962_p4 = scmp.lt.s32.totalorder %s1251_s16, %s960_s20  ;;  %p963_p5 = scmp.lt.s32.totalorder %s961_s21, %s955_s9 }
  0x27   : > { %805 = vmatprep.mubr.msk.f32.mxu1 %vm215_vm3, %v204_v16  ;;  %831 = vmatprep.mubr.msk.f32.mxu0 %vm215_vm3, %v202_v14 }
  0x28   : > { %p964_p6 = por %p963_p5, %p962_p4 }
  0x2a   : > { %806 = vmatmul.mubr.msk.f32.gmra.mrb[4].mxu1 %vm215_vm3, %v205_v17  ;;  %832 = vmatmul.mubr.msk.f32.vlgmr.msra.gmra.mrb[0].mxu0 %vm215_vm3, %v203_v15  ;;  %p965_p7 = pnand %p964_p6, %p958_p2 }
  0x2b   : > { %808 = vmatprep.mubr.msk.f32.mxu1 %vm215_vm3, %v206_v18  ;;  %834 = vmatprep.mubr.msk.f32.mxu0 %vm215_vm3, %v204_v16 }
  0x2e   : > { %809 = vmatmul.mubr.msk.f32.gmra.mrb[6].mxu1 %vm215_vm3, %v207_v19  ;;  %835 = vmatmul.mubr.msk.f32.gmra.mrb[2].mxu0 %vm215_vm3, %v205_v17 }
  0x2f   : > { %821 = vmatprep.mubr.msk.f32.mxu1 %vm215_vm3, %v202_v14  ;;  %837 = vmatprep.mubr.msk.f32.mxu0 %vm215_vm3, %v206_v18 }
  0x32   : > { %822 = vmatmul.mubr.msk.f32.vlgmr.msra.gmra.mrb[4].mxu1 %vm215_vm3, %v203_v15  ;;  %838 = vmatmul.mubr.msk.f32.gmra.mrb[4].mxu0 %vm215_vm3, %v207_v19 }
  0x33   : > { %824 = vmatprep.mubr.msk.f32.mxu1 %vm215_vm3, %v204_v16  ;;  %840 = vmatprep.mubr.msk.f32.mxu0 %vm215_vm3, %v208_v20 }
  0x36   : > { %825 = vmatmul.mubr.msk.f32.gmra.mrb[6].mxu1 %vm215_vm3, %v205_v17  ;;  %841 = vmatmul.mubr.msk.f32.gmra.mrb[6].mxu0 %vm215_vm3, %v209_v21 }
  0xf5   : > { %v801_v22 = vpop.f32.mrb[0].mxu1 }
  0xf6   : > { %v310_v23 = vpop.f32.mrb[1].mxu1 }
  0xf9   : > { %v804_v24 = vpop.f32.mrb[2].mxu1 }
  0xfa   : > { %v320_v25 = vpop.f32.mrb[3].mxu1 }
  0xfd   : > { %v833_v26 = vpop.f32.mrb[0].mxu0 }
  0xfe   : > { %v863_v28 = vadd.f32 %v833_v26, %v801_v22  ;;  %v541_v29 = vpop.f32.mrb[1].mxu0 }
  0xff   : > { %v864_v30 = vadd.f32 %v541_v29, %v310_v23 }
 0x100   : > { %v596_v31 = vadd.f32 %v863_v28, %v758_v27 }
 0x101   : > { %v595_v32 = vadd.f32 %v864_v30, %v758_v27  ;;  %v836_v33 = vpop.f32.mrb[2].mxu0 }
 0x102   : > { %v604_v34 = vmax.f32 %v596_v31, 0.0  ;;  %v865_v35 = vadd.f32 %v836_v33, %v804_v24  ;;  %v551_v36 = vpop.f32.mrb[3].mxu0 }
 0x103   : > { %v603_v37 = vmax.f32 %v595_v32, 0.0  ;;  %v866_v38 = vadd.f32 %v551_v36, %v320_v25 }
 0x104   : > { %612 = vst [vmem:[%s1235_s27 + $0x8] sm:$0xff] %v604_v34  ;;  %v598_v39 = vadd.f32 %v865_v35, %v758_v27 }
 0x105   : > { %611 = vst [vmem:[%s1235_s27] sm:$0xff] %v603_v37  ;;  %v597_v40 = vadd.f32 %v866_v38, %v758_v27  ;;  %v823_v41 = vpop.f32.mrb[4].mxu1  ;;  %v839_v42 = vpop.f32.mrb[4].mxu0 }
 0x106   : > { %v606_v43 = vmax.f32 %v598_v39, 0.0  ;;  %v867_v44 = vadd.f32 %v839_v42, %v823_v41  ;;  %v444_v45 = vpop.f32.mrb[5].mxu1  ;;  %v561_v46 = vpop.f32.mrb[5].mxu0 }
 0x107   : > { %v605_v47 = vmax.f32 %v597_v40, 0.0  ;;  %v868_v48 = vadd.f32 %v561_v46, %v444_v45 }
 0x108   : > { %614 = vst [vmem:[%s1235_s27 + $0x18] sm:$0xff] %v606_v43  ;;  %v600_v49 = vadd.f32 %v867_v44, %v758_v27 }
 0x109   : > { %613 = vst [vmem:[%s1235_s27 + $0x10] sm:$0xff] %v605_v47  ;;  %v599_v50 = vadd.f32 %v868_v48, %v758_v27  ;;  %v826_v51 = vpop.f32.mrb[6].mxu1  ;;  %v842_v52 = vpop.f32.mrb[6].mxu0 }
 0x10a   : > { %v608_v53 = vmax.f32 %v600_v49, 0.0  ;;  %v869_v54 = vadd.f32 %v842_v52, %v826_v51  ;;  %v454_v55 = vpop.f32.mrb[7].mxu1  ;;  %v571_v56 = vpop.f32.mrb[7].mxu0 }
 0x10b   : > { %v607_v57 = vmax.f32 %v599_v50, 0.0  ;;  %v870_v58 = vadd.f32 %v571_v56, %v454_v55 }
 0x10c   : > { %616 = vst [vmem:[%s1235_s27 + $0x28] sm:$0xff] %v608_v53  ;;  %v602_v59 = vadd.f32 %v869_v54, %v758_v27 }
 0x10d   : > { %615 = vst [vmem:[%s1235_s27 + $0x20] sm:$0xff] %v607_v57  ;;  %v601_v60 = vadd.f32 %v870_v58, %v758_v27 }
 0x10e   : > { %v610_v61 = vmax.f32 %v602_v59, 0.0 }
 0x10f   : > { %v609_v62 = vmax.f32 %v601_v60, 0.0 }
 0x110   : > { %618 = vst [vmem:[%s1235_s27 + $0x38] sm:$0xff] %v610_v61 }
 0x111   : > { %617 = vst [vmem:[%s1235_s27 + $0x30] sm:$0xff] %v609_v62 }
 0x112   : > { %968 = shalt.err (!%p965_p7)
}
 0x113   : > { %s969_s11 = scalar_lea.hbm %s1249_s7, 1024  ;;  %s973_s28 = scalar_lea.hbm %s1312_s3, 8192 }
 0x114   : > { %p970_p9 = scmp.ne.s32.totalorder %s1249_s7, %s969_s11  ;;  %p974_p12 = scmp.lt.u32.totalorder %s1249_s7, %s1312_s3 }
 0x115   : > { %p975_p13 = scmp.lt.u32.totalorder %s973_s28, %s969_s11  ;;  %p977_p1 = scmp.lt.u32.totalorder %s969_s11, %s1249_s7 }
 0x116   : > { %p971_p10 = pnand %p970_p9, %p1126_p3 }
 0x117   : > { %p976_p0 = por %p975_p13, %p974_p12 }
 0x118   : > { %p972_p11 = pneg %p971_p10 }
 0x119   : > { %p978_p2 = por %p977_p1, %p976_p0 }
 0x11b   : > { %p979_p4 = pnand %p978_p2, %p972_p11 }
 0x11d   : > { %982 = shalt.err (!%p979_p4)
}
 0x11e   : > { %s1053_s15 = smov 128   ;;  %s1054_s5 = smov 8  }
 0x11f   : > { %881 = dma.vmem_to_hbm [thread:$0]  (%p1126_p3), %s1251_s16, 1024, %s1249_s7, %s1257_s8, %s1053_s15, %s1053_s15, %s1054_s5  }
 0x120 PF: > { %p887_p5 = scmp.ge.s32.totalorder %s1049_s19, 2  ;;  %s650_s6 = sand.u32 1, %s1021_s12  }
 0x121   : > { %s651_s9 = scalar_lea.sflag [#allocation3], %s650_s6 }
 0x122   : > { %p884_p6 = pnand %p887_p5, %p1135_p8 }
 0x124   : > { %1016 = dma.done.wait (!%p884_p6), %s651_s9, 1024  }
 0x125   : > { %1018 = vsyncadd (!%p884_p6), %s651_s9, 4294966272  ;;  %s16_s19 = sadd.s32 1, %s1049_s19   ;;  %s1317_s12 = smov %s1025_s13 }
 0x126   : > { %p13_p7 = scmp.ge.s32.totalorder %s16_s19, 10   ;;  %s1318_s13 = smov %s1029_s14 }
 0x127   : > { %s1319_s14 = smov %s1144_s30  ;;  %s1320_s15 = smov %s1041_s17 }
 0x128   : > { %s1321_s16 = smov %s1045_s18  ;;  %s1322_s17 = smov %s1325_s22 }
 0x129   : > { %s1323_s18 = smov %s1329_s23  ;;  %15 = sbr.rel (!%p13_p7) target bundleno = 5 (0x5), region = 69 }
 0x130   :  { %656 = vsyncpa [#allocation3], 1 }
 0x131   :  { %658 = vsyncpa [#allocation3 + $0x1], 1 }

</bundles_post_ra>
